<compile_context>
chip_gen: v5e
topology: v5e:2x2
jax: 0.10.0
libtpu: 0.0.40
codegen_flags: <defaults>
</compile_context>

<pallas_src>
import jax
import jax.numpy as jnp
from jax.experimental import pallas as pl
from jax.experimental.pallas import tpu as pltpu


def _cdiv(a, b):
    return -(-a // b)


def _round_up(n, m):
    return ((n + m - 1) // m) * m


def probe_kernel(x_ref,
                 w1_ref, b1_ref,
                 w2_ref, b2_ref,
                 w3_ref, b3_ref,
                 w4_ref, b4_ref,
                 o_ref):
    # Load the batch tile; cast to bf16 for the MXU (f32 accumulation).
    x = x_ref[...].astype(jnp.bfloat16)

    # fc1 + ReLU
    h = jnp.dot(x, w1_ref[...], preferred_element_type=jnp.float32)
    h = jnp.maximum(h + b1_ref[...], 0.0)
    # fc2 + ReLU
    h = jnp.dot(h.astype(jnp.bfloat16), w2_ref[...],
                preferred_element_type=jnp.float32)
    h = jnp.maximum(h + b2_ref[...], 0.0)
    # fc3 + ReLU
    h = jnp.dot(h.astype(jnp.bfloat16), w3_ref[...],
                preferred_element_type=jnp.float32)
    h = jnp.maximum(h + b3_ref[...], 0.0)                 # (tile_b, 64) f32

    # fc4 (64 -> 1) as a lane-dense head: one XLU transpose of the small
    # activation block, sublane reduction over the 64 features, bias, exact
    # sigmoid.  Result is a (1, tile_b) row -> dense, unmasked store.
    h_t = h.T                                              # (64, tile_b) f32
    logit = jnp.sum(h_t * w4_ref[...], axis=0, keepdims=True) + b4_ref[...]
    o_ref[0] = 1.0 / (1.0 + jnp.exp(-logit))               # (1, tile_b)


def prepare_params(params):
    """One-time re-layout of the (in, out)-convention parameters.

    w1..w3 -> bf16 (MXU inputs); biases stay f32 as (1, out) rows; the fc4
    weight is kept f32 as a (64, 1) column for the in-kernel sublane
    reduction; fc4 bias is (1, 1) f32.
    """
    w1, b1, w2, b2, w3, b3, w4, b4 = params
    f32, bf16 = jnp.float32, jnp.bfloat16
    return (
        w1.astype(bf16), b1.reshape(1, -1).astype(f32),
        w2.astype(bf16), b2.reshape(1, -1).astype(f32),
        w3.astype(bf16), b3.reshape(1, -1).astype(f32),
        w4.reshape(-1, 1).astype(f32), b4.reshape(1, 1).astype(f32),
    )


def _choose_tile_b(B, input_dim, x_itemsize, tile_b_max=1024,
                   vmem_budget_bytes=12 * 1024 * 1024):
    """Largest multiple-of-8 batch tile such that
      (a) double-buffered x tile + intermediates + resident weights stay under
          a VMEM budget that fits every generation's default scoped limit
          (v5e 16 MiB, v6e 32 MiB, v7x 32 MiB of 64 MiB physical), and
      (b) the grid has >= 2 steps whenever B allows, so v7x's two TensorCores
          both get work under dimension_semantics=("parallel",).
    """
    lane = 128
    # Per-row bytes: double-buffered lane-padded x row + f32/bf16 hiddens.
    per_row = 2 * _round_up(input_dim, lane) * x_itemsize
    per_row += (256 + 128 + 64) * (4 + 2) + 2 * lane * 4
    # Resident weights/biases (double-buffered by default pipelining).
    weights = 2 * (_round_up(input_dim, 8) * 256 * 2 + 256 * 128 * 2
                   + 128 * 64 * 2 + 64 * 4 + (256 + 128 + 64 + 1) * 4)
    avail = max(vmem_budget_bytes - weights, 8 * per_row)
    tile = min(tile_b_max, max(8, (avail // per_row) // 8 * 8))
    # >= 2 grid steps when possible (v7x megacore), never exceed the batch.
    tile = min(tile, max(8, _round_up(_cdiv(B, 2), 8)))
    tile = min(tile, _round_up(B, 8))
    return int(tile)


def probe_forward(x, prepped_params, *, tile_b_max=1024):
    """x: (B, input_dim) float32 or bfloat16 -> (B, 1) float32.

    Callers that can produce x directly in bf16 should do so (halves the
    dominant HBM stream); no wrapper-side cast is inserted here.
    """
    w1, b1, w2, b2, w3, b3, w4, b4 = prepped_params
    B, input_dim = x.shape

    tile_b = _choose_tile_b(B, input_dim, x.dtype.itemsize, tile_b_max)
    num_tiles = _cdiv(B, tile_b)

    const = lambda i: (0, 0)   # resident weights/biases: block never changes

    weight_bytes = sum(int(a.size) * a.dtype.itemsize for a in prepped_params)
    cost = pl.CostEstimate(
        flops=2 * B * (input_dim * 256 + 256 * 128 + 128 * 64 + 64),
        transcendentals=B,
        bytes_accessed=B * input_dim * x.dtype.itemsize + B * 4 + weight_bytes,
    )

    out = pl.pallas_call(
        probe_kernel,
        out_shape=jax.ShapeDtypeStruct((num_tiles, 1, tile_b), jnp.float32),
        grid=(num_tiles,),
        in_specs=[
            # Streamed batch tile; the final partial block (B % tile_b != 0)
            # is handled by Pallas — no full-array pad of x.
            pl.BlockSpec((tile_b, input_dim), lambda i: (i, 0)),
            pl.BlockSpec(w1.shape, const), pl.BlockSpec(b1.shape, const),
            pl.BlockSpec(w2.shape, const), pl.BlockSpec(b2.shape, const),
            pl.BlockSpec(w3.shape, const), pl.BlockSpec(b3.shape, const),
            pl.BlockSpec(w4.shape, const), pl.BlockSpec(b4.shape, const),
        ],
        # Lane-dense output: one (1, tile_b) row slab per grid step.
        out_specs=pl.BlockSpec((1, 1, tile_b), lambda i: (i, 0, 0)),
        compiler_params=pltpu.CompilerParams(
            dimension_semantics=("parallel",)),
        cost_estimate=cost,
    )(x, w1, b1, w2, b2, w3, b3, w4, b4)

    # Tiny relayout of the per-tile scalar rows back to (B, 1).
    return out.reshape(-1)[:B].reshape(B, 1)


def init_params(key, input_dim):
    """Deterministic init mimicking PyTorch's default U(-1/sqrt(fan_in), +1/sqrt(fan_in))."""
    dims = [(input_dim, 256), (256, 128), (128, 64), (64, 1)]
    params = []
    for fan_in, fan_out in dims:
        kw, kb, key = jax.random.split(key, 3)
        bound = 1.0 / jnp.sqrt(float(fan_in))
        w = jax.random.uniform(kw, (fan_in, fan_out), jnp.float32, -bound, bound)
        b = jax.random.uniform(kb, (fan_out,), jnp.float32, -bound, bound)
        params += [w, b]
    return params


if __name__ == "__main__":
    key = jax.random.PRNGKey(0)
    kx, kp = jax.random.split(key)

    batch = 8
    input_dim = 32
    x = jax.random.normal(kx, (batch, input_dim), jnp.float32)
    params = init_params(kp, input_dim)
    prepped = prepare_params(params)

    out = probe_forward(x, prepped)
    out = jax.block_until_ready(out)
    assert out.shape == (batch, 1)

    w1, b1, w2, b2, w3, b3, w4, b4 = params
    bf = jnp.bfloat16

    # Reference matching the kernel's precision (bf16 MXU inputs, f32 accum).
    h = jnp.maximum(jnp.dot(x.astype(bf), w1.astype(bf),
                            preferred_element_type=jnp.float32) + b1, 0.0)
    h = jnp.maximum(jnp.dot(h.astype(bf), w2.astype(bf),
                            preferred_element_type=jnp.float32) + b2, 0.0)
    h = jnp.maximum(jnp.dot(h.astype(bf), w3.astype(bf),
                            preferred_element_type=jnp.float32) + b3, 0.0)
    ref_bf16 = jax.nn.sigmoid(h @ w4 + b4)
    assert jnp.allclose(out, ref_bf16, atol=2e-3, rtol=0.0)

    # Full-f32 (PyTorch-semantics) reference; looser tolerance for bf16 matmuls.
    h = jnp.maximum(x @ w1 + b1, 0.0)
    h = jnp.maximum(h @ w2 + b2, 0.0)
    h = jnp.maximum(h @ w3 + b3, 0.0)
    ref_f32 = jax.nn.sigmoid(h @ w4 + b4)
    assert jnp.allclose(out, ref_f32, atol=3e-2, rtol=0.0)

    print("KERNEL_OK")
</pallas_src>

<mosaic_0001>
module attributes {stable_mosaic.version = 11 : i64} {
  func.func @probe_kernel(%arg0: i32, %arg1: memref<8x32xf32, #tpu.memory_space<vmem>>, %arg2: memref<32x256xbf16, #tpu.memory_space<vmem>>, %arg3: memref<1x256xf32, #tpu.memory_space<vmem>>, %arg4: memref<256x128xbf16, #tpu.memory_space<vmem>>, %arg5: memref<1x128xf32, #tpu.memory_space<vmem>>, %arg6: memref<128x64xbf16, #tpu.memory_space<vmem>>, %arg7: memref<1x64xf32, #tpu.memory_space<vmem>>, %arg8: memref<64x1xf32, #tpu.memory_space<vmem>>, %arg9: memref<1x1xf32, #tpu.memory_space<vmem>>, %arg10: memref<1x1x8xf32, #tpu.memory_space<vmem>>) attributes {dimension_semantics = [#tpu.dimension_semantics<parallel>], iteration_bounds = array<i64: 1>, scalar_prefetch = 0 : i64, scratch_operands = 0 : i64, tpu.core_type = #tpu.core_type<tc>, window_params = [{transform_indices = @transform_0, window_bounds = array<i64: 8, 32>}, {pipeline_mode = #tpu.pipeline_mode<synchronous>, transform_indices = @transform_1, window_bounds = array<i64: 32, 256>}, {pipeline_mode = #tpu.pipeline_mode<synchronous>, transform_indices = @transform_2, window_bounds = array<i64: 1, 256>}, {pipeline_mode = #tpu.pipeline_mode<synchronous>, transform_indices = @transform_3, window_bounds = array<i64: 256, 128>}, {pipeline_mode = #tpu.pipeline_mode<synchronous>, transform_indices = @transform_4, window_bounds = array<i64: 1, 128>}, {pipeline_mode = #tpu.pipeline_mode<synchronous>, transform_indices = @transform_5, window_bounds = array<i64: 128, 64>}, {pipeline_mode = #tpu.pipeline_mode<synchronous>, transform_indices = @transform_6, window_bounds = array<i64: 1, 64>}, {pipeline_mode = #tpu.pipeline_mode<synchronous>, transform_indices = @transform_7, window_bounds = array<i64: 64, 1>}, {pipeline_mode = #tpu.pipeline_mode<synchronous>, transform_indices = @transform_8, window_bounds = array<i64: 1, 1>}, {transform_indices = @transform_9, window_bounds = array<i64: 1, 1, 8>}]} {
    %c0 = arith.constant 0 : index
    %c0_0 = arith.constant 0 : index
    %0 = vector.load %arg1[%c0, %c0_0] : memref<8x32xf32, #tpu.memory_space<vmem>>, vector<8x32xf32>
    %1 = arith.truncf %0 : vector<8x32xf32> to vector<8x32xbf16>
    %c0_1 = arith.constant 0 : index
    %c0_2 = arith.constant 0 : index
    %2 = vector.load %arg2[%c0_1, %c0_2] : memref<32x256xbf16, #tpu.memory_space<vmem>>, vector<32x256xbf16>
    %cst = arith.constant dense<0.000000e+00> : vector<8x256xf32>
    %3 = tpu.matmul %1, %2, %cst {dimension_numbers = #tpu.dot_dimension_numbers<[1], [0], [0], [1], [0, 0, 1, 1], [], []>} : vector<8x32xbf16>, vector<32x256xbf16>, vector<8x256xf32> -> vector<8x256xf32>
    %c0_3 = arith.constant 0 : index
    %c0_4 = arith.constant 0 : index
    %4 = vector.load %arg3[%c0_3, %c0_4] : memref<1x256xf32, #tpu.memory_space<vmem>>, vector<1x256xf32>
    %5 = vector.broadcast %4 : vector<1x256xf32> to vector<8x256xf32>
    %6 = arith.addf %3, %5 : vector<8x256xf32>
    %cst_5 = arith.constant 0.000000e+00 : f32
    %7 = vector.broadcast %cst_5 : f32 to vector<8x256xf32>
    %8 = arith.maximumf %6, %7 : vector<8x256xf32>
    %9 = arith.truncf %8 : vector<8x256xf32> to vector<8x256xbf16>
    %c0_6 = arith.constant 0 : index
    %c0_7 = arith.constant 0 : index
    %10 = vector.load %arg4[%c0_6, %c0_7] : memref<256x128xbf16, #tpu.memory_space<vmem>>, vector<256x128xbf16>
    %cst_8 = arith.constant dense<0.000000e+00> : vector<8x128xf32>
    %11 = tpu.matmul %9, %10, %cst_8 {dimension_numbers = #tpu.dot_dimension_numbers<[1], [0], [0], [1], [0, 0, 1, 1], [], []>} : vector<8x256xbf16>, vector<256x128xbf16>, vector<8x128xf32> -> vector<8x128xf32>
    %c0_9 = arith.constant 0 : index
    %c0_10 = arith.constant 0 : index
    %12 = vector.load %arg5[%c0_9, %c0_10] : memref<1x128xf32, #tpu.memory_space<vmem>>, vector<1x128xf32>
    %13 = vector.broadcast %12 : vector<1x128xf32> to vector<8x128xf32>
    %14 = arith.addf %11, %13 : vector<8x128xf32>
    %cst_11 = arith.constant 0.000000e+00 : f32
    %15 = vector.broadcast %cst_11 : f32 to vector<8x128xf32>
    %16 = arith.maximumf %14, %15 : vector<8x128xf32>
    %17 = arith.truncf %16 : vector<8x128xf32> to vector<8x128xbf16>
    %c0_12 = arith.constant 0 : index
    %c0_13 = arith.constant 0 : index
    %18 = vector.load %arg6[%c0_12, %c0_13] : memref<128x64xbf16, #tpu.memory_space<vmem>>, vector<128x64xbf16>
    %cst_14 = arith.constant dense<0.000000e+00> : vector<8x64xf32>
    %19 = tpu.matmul %17, %18, %cst_14 {dimension_numbers = #tpu.dot_dimension_numbers<[1], [0], [0], [1], [0, 0, 1, 1], [], []>} : vector<8x128xbf16>, vector<128x64xbf16>, vector<8x64xf32> -> vector<8x64xf32>
    %c0_15 = arith.constant 0 : index
    %c0_16 = arith.constant 0 : index
    %20 = vector.load %arg7[%c0_15, %c0_16] : memref<1x64xf32, #tpu.memory_space<vmem>>, vector<1x64xf32>
    %21 = vector.broadcast %20 : vector<1x64xf32> to vector<8x64xf32>
    %22 = arith.addf %19, %21 : vector<8x64xf32>
    %cst_17 = arith.constant 0.000000e+00 : f32
    %23 = vector.broadcast %cst_17 : f32 to vector<8x64xf32>
    %24 = arith.maximumf %22, %23 : vector<8x64xf32>
    %25 = tpu.transpose %24, [1, 0] : vector<8x64xf32> -> vector<64x8xf32>
    %c0_18 = arith.constant 0 : index
    %c0_19 = arith.constant 0 : index
    %26 = vector.load %arg8[%c0_18, %c0_19] : memref<64x1xf32, #tpu.memory_space<vmem>>, vector<64x1xf32>
    %27 = vector.broadcast %26 : vector<64x1xf32> to vector<64x8xf32>
    %28 = arith.mulf %25, %27 : vector<64x8xf32>
    %cst_20 = arith.constant dense<0.000000e+00> : vector<8xf32>
    %29 = vector.multi_reduction <add>, %28, %cst_20 [0] : vector<64x8xf32> to vector<8xf32>
    %30 = vector.shape_cast %29 : vector<8xf32> to vector<1x8xf32>
    %c0_21 = arith.constant 0 : index
    %c0_22 = arith.constant 0 : index
    %31 = vector.load %arg9[%c0_21, %c0_22] : memref<1x1xf32, #tpu.memory_space<vmem>>, vector<1x1xf32>
    %32 = vector.broadcast %31 : vector<1x1xf32> to vector<1x8xf32>
    %33 = arith.addf %30, %32 : vector<1x8xf32>
    %cst_23 = arith.constant 0.000000e+00 : f32
    %34 = vector.broadcast %cst_23 : f32 to vector<1x8xf32>
    %35 = arith.subf %34, %33 : vector<1x8xf32>
    %36 = math.exp %35 : vector<1x8xf32>
    %cst_24 = arith.constant 1.000000e+00 : f32
    %37 = vector.broadcast %cst_24 : f32 to vector<1x8xf32>
    %38 = arith.addf %37, %36 : vector<1x8xf32>
    %cst_25 = arith.constant 1.000000e+00 : f32
    %39 = vector.broadcast %cst_25 : f32 to vector<1x8xf32>
    %40 = arith.divf %39, %38 : vector<1x8xf32>
    %c0_26 = arith.constant 0 : index
    %c0_27 = arith.constant 0 : index
    %c0_28 = arith.constant 0 : index
    %41 = vector.load %arg10[%c0_26, %c0_27, %c0_28] : memref<1x1x8xf32, #tpu.memory_space<vmem>>, vector<1x1x8xf32>
    %42 = vector.shape_cast %41 : vector<1x1x8xf32> to vector<1x8xf32>
    %43 = vector.shape_cast %40 : vector<1x8xf32> to vector<1x1x8xf32>
    tpu.vector_store %arg10[%c0_26, %c0_27, %c0_28], %43 {strides = array<i32>} : memref<1x1x8xf32, #tpu.memory_space<vmem>>, vector<1x1x8xf32>,
    return
  }
  func.func @transform_0(%arg0: i32) -> (i32, i32) {
    %c0_i32 = arith.constant 0 : i32
    %c0_i32_0 = arith.constant 0 : i32
    return %arg0, %c0_i32 : i32, i32
  }
  func.func @transform_1(%arg0: i32) -> (i32, i32) {
    %c0_i32 = arith.constant 0 : i32
    %c0_i32_0 = arith.constant 0 : i32
    %c0_i32_1 = arith.constant 0 : i32
    return %c0_i32, %c0_i32_0 : i32, i32
  }
  func.func @transform_2(%arg0: i32) -> (i32, i32) {
    %c0_i32 = arith.constant 0 : i32
    %c0_i32_0 = arith.constant 0 : i32
    %c0_i32_1 = arith.constant 0 : i32
    return %c0_i32, %c0_i32_0 : i32, i32
  }
  func.func @transform_3(%arg0: i32) -> (i32, i32) {
    %c0_i32 = arith.constant 0 : i32
    %c0_i32_0 = arith.constant 0 : i32
    %c0_i32_1 = arith.constant 0 : i32
    return %c0_i32, %c0_i32_0 : i32, i32
  }
  func.func @transform_4(%arg0: i32) -> (i32, i32) {
    %c0_i32 = arith.constant 0 : i32
    %c0_i32_0 = arith.constant 0 : i32
    %c0_i32_1 = arith.constant 0 : i32
    return %c0_i32, %c0_i32_0 : i32, i32
  }
  func.func @transform_5(%arg0: i32) -> (i32, i32) {
    %c0_i32 = arith.constant 0 : i32
    %c0_i32_0 = arith.constant 0 : i32
    %c0_i32_1 = arith.constant 0 : i32
    return %c0_i32, %c0_i32_0 : i32, i32
  }
  func.func @transform_6(%arg0: i32) -> (i32, i32) {
    %c0_i32 = arith.constant 0 : i32
    %c0_i32_0 = arith.constant 0 : i32
    %c0_i32_1 = arith.constant 0 : i32
    return %c0_i32, %c0_i32_0 : i32, i32
  }
  func.func @transform_7(%arg0: i32) -> (i32, i32) {
    %c0_i32 = arith.constant 0 : i32
    %c0_i32_0 = arith.constant 0 : i32
    %c0_i32_1 = arith.constant 0 : i32
    return %c0_i32, %c0_i32_0 : i32, i32
  }
  func.func @transform_8(%arg0: i32) -> (i32, i32) {
    %c0_i32 = arith.constant 0 : i32
    %c0_i32_0 = arith.constant 0 : i32
    %c0_i32_1 = arith.constant 0 : i32
    return %c0_i32, %c0_i32_0 : i32, i32
  }
  func.func @transform_9(%arg0: i32) -> (i32, i32, i32) {
    %c0_i32 = arith.constant 0 : i32
    %c0_i32_0 = arith.constant 0 : i32
    %c0_i32_1 = arith.constant 0 : i32
    return %arg0, %c0_i32, %c0_i32_0 : i32, i32, i32
  }
}

</mosaic_0001>

<bundles_post_ra>
// kernel: tpu_custom_call.1
= control target key start
LH: loop header
LB: loop body
LE: loop exit
PB: predicated region body
PF: predicated region fallthrough
CT: control target
= control target key end

     0   :  { %s920_s0 = inlined_call_operand.hbm [shape: f32[8,32], index: 0, kind: input, shape index: {}]   ;;  %s921_s1 = inlined_call_operand.vmem [shape: bf16[32,256], index: 1, kind: input, shape index: {}]   ;;  %s922_s2 = inlined_call_operand.vmem [shape: f32[1,256], index: 2, kind: input, shape index: {}]   ;;  %s923_s3 = inlined_call_operand.vmem [shape: bf16[256,128], index: 3, kind: input, shape index: {}]   ;;  %s924_s4 = inlined_call_operand.vmem [shape: f32[1,128], index: 4, kind: input, shape index: {}]   ;;  %s925_s5 = inlined_call_operand.vmem [shape: bf16[128,64], index: 5, kind: input, shape index: {}]   ;;  %s926_s6 = inlined_call_operand.vmem [shape: f32[1,64], index: 6, kind: input, shape index: {}]   ;;  %s927_s7 = inlined_call_operand.vmem [shape: f32[64,1], index: 7, kind: input, shape index: {}]   ;;  %s928_s8 = inlined_call_operand.<no memory space> [shape: f32[1,1], index: 8, kind: input, shape index: {}]   ;;  %s929_s9 = inlined_call_operand.hbm [shape: f32[1,1,8], index: 9, kind: output, shape index: {}]  }
   0x1   :  { %v14_v0 = vstv %s928_s8 }
   0x2   :  { %15 = vst [vmem:[#allocation2] sm:$0x1] %v14_v0 }
   0x3   :  { %16 = vsyncpa [#allocation4], 0 }
   0x4   :  { %17 = vsyncpa [#allocation5], 0  ;;  %s23_s13 = sshll.u32 %s920_s0, 4  ;;  %s721_s14 = smov [#allocation3]   ;;  %s24_s13 = int_to_ptr.hbm [resolvable:$true] %s23_s13 }
   0x5   :  { %s25_s15 = sshll.u32 %s721_s14, 4  ;;  %s26_s15 = int_to_ptr.vmem [resolvable:$true] %s25_s15 }
   0x6   :  { %28 = dma.hbm_to_vmem [thread:$0]  %s24_s13, 128, %s26_s15, [#allocation4]  }
   0x7   :  { %717 = dma.done.wait [#allocation4], 128  }
   0x8   :  { %718 = vsyncadd [#allocation4], 4294967168  ;;  %v524_v1 = vld [vmem:[%s921_s1 + $0x10] sm:$0xf]  ;;  %v631_v2 = vld [vmem:[%s921_s1 + $0x14] sm:$0xf0] }
   0x9   :  { %v516_v3 = vld [vmem:[%s921_s1] sm:$0xf]  ;;  %v525_v4 = vor.u32 %v631_v2, %v524_v1  ;;  %v629_v5 = vld [vmem:[%s921_s1 + $0x4] sm:$0xf0]  ;;  %v630_v6 = vld [vmem:[%s921_s1 + $0x14] sm:$0xf] }
   0xa   :  { %v526_v7 = vld [vmem:[%s921_s1 + $0x18] sm:$0xf0]  ;;  %v517_v8 = vor.u32 %v629_v5, %v516_v3  ;;  %v50_v9 = vld [vmem:[#allocation3] sm:$0xff]  ;;  %v518_v14 = vld [vmem:[%s921_s1 + $0x8] sm:$0xf0]  ;;  %vm82_vm0 = vcmask 261120  }
   0xb   :  { %92 = vmatpush.bf16.msra.mxu1 %v525_v4  ;;  %v639_v10 = vld [vmem:[%s923_s3 + $0x38] sm:$0xff]  ;;  %v529_v11 = vor.u32 %v630_v6, %v526_v7  ;;  %v628_v13 = vld [vmem:[%s921_s1 + $0x4] sm:$0xf]  ;;  %v638_v15 = vld [vmem:[%s923_s3 + $0x30] sm:$0xff]  ;;  %v51_v16 = vpack.c.bf16 %v50_v9, %v50_v9  ;;  %v722_v62 = vmov 0   ;;  %vm446_vm1 = vcmask 64512  }
   0xc   :  { %v647_v12 = vld [vmem:[%s923_s3 + $0x78] sm:$0xff]  ;;  %248 = vmatpush.bf16.msra.mxu2 %v639_v10  ;;  %v646_v17 = vld [vmem:[%s923_s3 + $0x70] sm:$0xff]  ;;  %v521_v18 = vor.u32 %v628_v13, %v518_v14  ;;  %v637_v19 = vld [vmem:[%s923_s3 + $0x28] sm:$0xff]  ;;  %661 = vset.pattern.permute.xlu1 %v722_v62  ;;  %s504_s24 = sshll.u32 %s929_s9, 4  ;;  %vm495_vm5 = vcmask 57344   ;;  %s505_s24 = int_to_ptr.hbm [resolvable:$true] %s504_s24 }
   0xd   :  { %261 = vmatpush.bf16.msra.mxu3 %v647_v12  ;;  %v636_v20 = vld [vmem:[%s923_s3 + $0x20] sm:$0xff]  ;;  %v635_v21 = vld [vmem:[%s923_s3 + $0x18] sm:$0xff]  ;;  %v634_v22 = vld [vmem:[%s923_s3 + $0x10] sm:$0xff]  ;;  %662 = vset.pattern.permute.xlu2 %v722_v62 }
   0xe   :  { %v633_v23 = vld [vmem:[%s923_s3 + $0x8] sm:$0xff]  ;;  %v632_v25 = vld [vmem:[%s923_s3] sm:$0xff]  ;;  %v643_v27 = vld [vmem:[%s923_s3 + $0x58] sm:$0xff] }
   0xf   :  { %93 = vmatpush.bf16.msra.mxu1 %v517_v8  ;;  %v645_v24 = vld [vmem:[%s923_s3 + $0x68] sm:$0xff]  ;;  %v644_v26 = vld [vmem:[%s923_s3 + $0x60] sm:$0xff]  ;;  %v642_v28 = vld [vmem:[%s923_s3 + $0x50] sm:$0xff] }
  0x10   :  { %249 = vmatpush.bf16.msra.mxu2 %v638_v15  ;;  %v641_v29 = vld [vmem:[%s923_s3 + $0x48] sm:$0xff]  ;;  %v640_v30 = vld [vmem:[%s923_s3 + $0x40] sm:$0xff]  ;;  %v655_v31 = vld [vmem:[%s925_s5 + $0x38] sm:$0xff] }
  0x11   :  { %262 = vmatpush.bf16.msra.mxu3 %v646_v17  ;;  %v56_v32 = vld [vmem:[%s922_s2] sm:$0x3]  ;;  %344 = vmatpush.bf16.msra.mxu0 %v655_v31  ;;  %v654_v33 = vld [vmem:[%s925_s5 + $0x30] sm:$0xff]  ;;  %v653_v46 = vld [vmem:[%s925_s5 + $0x28] sm:$0xff] }
  0x12   :  { %530 = vmatmul.msk.bf16.vlgmr.msra.gmra.mxu1 %vm82_vm0, %v51_v16  ;;  %v58_v34 = vperm.slane %v56_v32, 0  ;;  %v59_v40 = vperm.slane %v56_v32, 1  ;;  %v652_v47 = vld [vmem:[%s925_s5 + $0x20] sm:$0xff]  ;;  %v651_v48 = vld [vmem:[%s925_s5 + $0x18] sm:$0xff]  ;;  %v650_v49 = vld [vmem:[%s925_s5 + $0x10] sm:$0xff] }
  0x13   :  { %105 = vmatpush.bf16.msrb.mxu1 %v529_v11  ;;  %v649_v50 = vld [vmem:[%s925_s5 + $0x8] sm:$0xff]  ;;  %v648_v51 = vld [vmem:[%s925_s5] sm:$0xff]  ;;  %v393_v63 = vld [vmem:[%s927_s7 + $0x18] sm:$0xff] }
  0x14   :  { %250 = vmatpush.bf16.msra.mxu2 %v637_v19  ;;  %v663_v54 = vld [vmem:[%s924_s4] ss:$0 sm:$0xff]  ;;  %v391_v61 = vld [vmem:[%s927_s7 + $0x8] sm:$0xff]  ;;  %415 = vperm.xlu2 %662, %v393_v63   ;;  %v392_v0 = vld [vmem:[%s927_s7 + $0x10] sm:$0xff] }
  0x15   :  { %263 = vmatpush.bf16.msra.mxu3 %v645_v24  ;;  %345 = vmatpush.bf16.msra.mxu0 %v654_v33  ;;  %v394_v1 = vld [vmem:[%s927_s7 + $0x20] sm:$0xff]  ;;  %v395_v2 = vld [vmem:[%s927_s7 + $0x28] sm:$0xff]  ;;  %v397_v4 = vld [vmem:[%s927_s7 + $0x38] sm:$0xff] }
  0x16   :  { %405 = vperm.xlu1 %661, %v391_v61   ;;  %v664_v3 = vld [vmem:[%s926_s6] ss:$0 sm:$0xff]  ;;  %v396_v9 = vld [vmem:[%s927_s7 + $0x30] sm:$0xff] }
  0x17   :  { %106 = vmatpush.bf16.msrb.mxu1 %v521_v18  ;;  %v468_v10 = vld [vmem:[#allocation2] sm:$0x1] }
  0x18   :  { %251 = vmatpush.bf16.msra.mxu2 %v636_v20  ;;  %v390_v11 = vld [vmem:[%s927_s7] sm:$0xff]  ;;  %s723_s7 = smov [#allocation6]  }
  0x19   :  { %264 = vmatpush.bf16.msra.mxu3 %v644_v26  ;;  %346 = vmatpush.bf16.msra.mxu0 %v653_v46  ;;  %s502_s21 = sshll.u32 %s723_s7, 4  ;;  %s503_s21 = int_to_ptr.vmem [resolvable:$true] %s502_s21 }
  0x1c   :  { %252 = vmatpush.bf16.msra.mxu2 %v635_v21  ;;  %420 = vperm.xlu2 %662, %v394_v1  }
  0x1d   :  { %265 = vmatpush.bf16.msra.mxu3 %v643_v27  ;;  %347 = vmatpush.bf16.msra.mxu0 %v652_v47 }
  0x1e   :  { %410 = vperm.xlu1 %661, %v392_v0  }
  0x20   :  { %253 = vmatpush.bf16.msra.mxu2 %v634_v22 }
  0x21   :  { %266 = vmatpush.bf16.msra.mxu3 %v642_v28  ;;  %348 = vmatpush.bf16.msra.mxu0 %v651_v48 }
  0x22   :  { %531 = vmatmul.msk.bf16.vlgmr.msrb.gmra.mxu1 %vm82_vm0, %v51_v16 }
  0x24   :  { %254 = vmatpush.bf16.msra.mxu2 %v633_v23  ;;  %430 = vperm.xlu2 %662, %v396_v9  }
  0x25   :  { %267 = vmatpush.bf16.msra.mxu3 %v641_v29  ;;  %349 = vmatpush.bf16.msra.mxu0 %v650_v49 }
  0x26   :  { %425 = vperm.xlu1 %661, %v395_v2  }
  0x28   :  { %255 = vmatpush.bf16.msra.mxu2 %v632_v25 }
  0x29   :  { %268 = vmatpush.bf16.msra.mxu3 %v640_v30  ;;  %350 = vmatpush.bf16.msra.mxu0 %v649_v50 }
  0x2c   :  { %471 = vperm.xlu2 %662, %v468_v10  }
  0x2d   :  { %351 = vmatpush.bf16.msra.mxu0 %v648_v51 }
  0x2e   :  { %435 = vperm.xlu1 %661, %v397_v4  }
  0x6e   :  { %v416_v20 = vpop.permute.xlu2 %415 }
  0x76   :  { %v421_v23 = vpop.permute.xlu2 %420 }
  0x88   :  { %v406_v18 = vpop.permute.xlu1 %405 }
  0x8f   :  { %v95_v35 = vpop.f32.mrf.mxu1 }
  0x90   :  { %v96_v36 = vadd.f32 %v95_v35, %v58_v34  ;;  %v411_v21 = vpop.permute.xlu1 %410  ;;  %v431_v35 = vpop.permute.xlu2 %430 }
  0x92   :  { %v112_v37 = vmax.f32 %v96_v36, 0.0 }
  0x94   :  { %v114_v38 = vpack.c.bf16 %v112_v37, %v112_v37 }
  0x96   :  { %256 = vmatmul.bf16.vlgmr.msra.gmra.mxu2 %v114_v38 }
  0x97   :  { %v97_v39 = vpop.f32.mrf.mxu1 }
  0x98   :  { %v426_v25 = vpop.permute.xlu1 %425 }
  0x9f   :  { %v108_v41 = vpop.f32.mrf.mxu1 }
  0xa0   :  { %v109_v42 = vadd.f32 %v108_v41, %v59_v40  ;;  %v436_v39 = vpop.permute.xlu1 %435 }
  0xa2   :  { %v113_v43 = vmax.f32 %v109_v42, 0.0 }
  0xa4   :  { %v115_v44 = vpack.c.bf16 %v113_v43, %v113_v43 }
  0xa6   :  { %269 = vmatmul.bf16.vlgmr.msra.gmra.mxu3 %v115_v44 }
  0xa7   :  { %v110_v45 = vpop.f32.mrf.mxu1 }
 0x119   :  { %v257_v52 = vpop.f32.mrf.mxu2 }
 0x11a   :  { %v258_v55 = vadd.f32 %v663_v54, %v257_v52 }
 0x121   :  { %v259_v53 = vpop.f32.mrf.mxu2 }
 0x129   :  { %v270_v56 = vpop.f32.mrf.mxu3 }
 0x12a   :  { %v271_v57 = vadd.f32 %v270_v56, %v258_v55  ;;  %v472_v55 = vpop.permute.xlu2 %471 }
 0x12c   :  { %v274_v58 = vmax.f32 %v271_v57, 0.0  ;;  %v474_v57 = vperm.slane %v472_v55, 0 }
 0x12e   :  { %v275_v59 = vpack.c.bf16 %v274_v58, %v274_v58 }
 0x130   :  { %352 = vmatmul.bf16.vlgmr.msra.gmra.mxu0 %v275_v59 }
 0x131   :  { %v272_v60 = vpop.f32.mrf.mxu3 }
 0x1ad   :  { %v353_v5 = vpop.f32.mrf.mxu0 }
 0x1ae   :  { %v354_v6 = vadd.f32 %v664_v3, %v353_v5 }
 0x1b0   :  { %v357_v7 = vmax.f32 %v354_v6, 0.0 }
 0x1b2   :  { %358 = vxpose.xlu0.b32.start.end [1/1] (short) (narrow) %v357_v7, 64 }
 0x1b5   :  { %v355_v8 = vpop.f32.mrf.mxu0 }
 0x219   :  { %660 = vset.pattern.permute.xlu0 %v722_v62 }
 0x256   :  { %v374_v12 = vpop.trf.xlu0 }
 0x258   :  { %400 = vperm.xlu0 %660, %v390_v11  }
 0x25e   :  { %v375_v13 = vpop.trf.xlu0 }
 0x25f   :  { %v439_v24 = vmul.f32 %v406_v18, %v375_v13 }
 0x261   :  { %v448_v29 = vsel %vm446_vm1, %v439_v24, 0.0 }
 0x266   :  { %v376_v14 = vpop.trf.xlu0 }
 0x267   :  { %v440_v27 = vmul.f32 %v411_v21, %v376_v14 }
 0x269   :  { %v450_v33 = vsel %vm446_vm1, %v440_v27, 0.0 }
 0x26e   :  { %v377_v15 = vpop.trf.xlu0 }
 0x26f   :  { %v441_v30 = vmul.f32 %v416_v20, %v377_v15 }
 0x271   :  { %v452_v37 = vsel %vm446_vm1, %v441_v30, 0.0 }
 0x276   :  { %v378_v16 = vpop.trf.xlu0 }
 0x277   :  { %v442_v34 = vmul.f32 %v421_v23, %v378_v16 }
 0x279   :  { %v454_v41 = vsel %vm446_vm1, %v442_v34, 0.0 }
 0x27e   :  { %v379_v17 = vpop.trf.xlu0 }
 0x27f   :  { %v443_v38 = vmul.f32 %v426_v25, %v379_v17 }
 0x281   :  { %v456_v44 = vsel %vm446_vm1, %v443_v38, 0.0 }
 0x286   :  { %v380_v19 = vpop.trf.xlu0 }
 0x287   :  { %v444_v42 = vmul.f32 %v431_v35, %v380_v19 }
 0x289   :  { %v458_v47 = vsel %vm446_vm1, %v444_v42, 0.0 }
 0x28e   :  { %v381_v22 = vpop.trf.xlu0 }
 0x28f   :  { %v445_v45 = vmul.f32 %v436_v39, %v381_v22 }
 0x291   :  { %v460_v49 = vsel %vm446_vm1, %v445_v45, 0.0 }
 0x2ca   :  { %v401_v26 = vpop.permute.xlu0 %400 }
 0x2cb   :  { %v438_v28 = vmul.f32 %v401_v26, %v374_v12 }
 0x2cd   :  { %v447_v31 = vsel %vm446_vm1, %v438_v28, 0.0 }
 0x2ce   :  { %v449_v32 = vadd.f32 %v448_v29, %v447_v31 }
 0x2d0   :  { %v451_v36 = vadd.f32 %v450_v33, %v449_v32 }
 0x2d2   :  { %v453_v40 = vadd.f32 %v452_v37, %v451_v36 }
 0x2d4   :  { %v455_v43 = vadd.f32 %v454_v41, %v453_v40 }
 0x2d6   :  { %v457_v46 = vadd.f32 %v456_v44, %v455_v43 }
 0x2d8   :  { %v459_v48 = vadd.f32 %v458_v47, %v457_v46 }
 0x2da   :  { %v461_v50 = vadd.f32 %v460_v49, %v459_v48 }
 0x2dc   :  { %v462_v51 = vrot.slane %v461_v50, 4 }
 0x2de   :  { %v463_v52 = vadd.f32 %v462_v51, %v461_v50 }
 0x2e0   :  { %v464_v53 = vrot.slane %v463_v52, 2 }
 0x2e2   :  { %v465_v54 = vadd.f32 %v464_v53, %v463_v52 }
 0x2e4   :  { %v466_v56 = vrot.slane %v465_v54, 1 }
 0x2e6   :  { %v467_v58 = vadd.f32 %v466_v56, %v465_v54 }
 0x2e8   :  { %v475_v59 = vadd.f32 %v474_v57, %v467_v58 }
 0x2ea   :  { %v476_v60 = vsub.f32 0.0, %v475_v59 }
 0x2ec   :  { %v477_v61 = vmul.f32 1.442695, %v476_v60 }
 0x2ee   :  { %665 = vpow2.f32 %v477_v61 }
 0x2f4   :  { %v666_v62 = vpop.eup %665 }
 0x2f5   :  { %v479_v63 = vadd.f32 1.0, %v666_v62 }
 0x2f7   :  { %667 = vrcp.f32 %v479_v63  ;;  %v491_v3 = vand.u32 2147483648, %v479_v63  ;;  %v489_v5 = vand.u32 2147483647, %v479_v63  ;;  %vm485_vm3 = vweird.f32 %v479_v63 }
 0x2f9   :  { %v492_v7 = vor.u32 1.1754944e-38, %v491_v3  ;;  %vm490_vm6 = vcmp.eq.f32.partialorder %v489_v5, 8.507059e+37 }
 0x2fd   :  { %v668_v0 = vpop.eup %667 }
 0x2fe   :  { %v481_v1 = vmul.f32 %v668_v0, %v479_v63  ;;  %vm486_vm2 = vweird.f32 %v668_v0 }
 0x2ff   :  { %vm487_vm4 = vmor %vm485_vm3, %vm486_vm2 }
 0x300   :  { %v482_v2 = vsub.f32 1.0, %v481_v1 }
 0x302   :  { %v483_v4 = vmul.f32 %v668_v0, %v482_v2 }
 0x304   :  { %v484_v6 = vadd.f32 %v668_v0, %v483_v4 }
 0x306   :  { %v488_v8 = vsel %vm487_vm4, %v668_v0, %v484_v6 }
 0x307   :  { %v493_v9 = vsel %vm490_vm6, %v492_v7, %v488_v8 }
 0x308   :  { %496 = vst.msk [vmem:[#allocation6] sm:$0x1] %vm495_vm5, %v493_v9 }
 0x309   :  { %507 = dma.vmem_to_hbm [thread:$0]  %s503_s21, 16, %s505_s24, [#allocation5]  }
 0x30a   :  { %719 = dma.done.wait [#allocation5], 16  }
 0x30b   :  { %720 = vsyncadd [#allocation5], 4294967280 }
 0x30c   :  { %512 = vsyncpa [#allocation4], 1 }
 0x30d   :  { %513 = vsyncpa [#allocation5], 1 }

</bundles_post_ra>
